<compile_context>
chip_gen: v7x
topology: tpu7x:2x2x1
jax: 0.10.0
libtpu: 0.0.40
codegen_flags: <defaults>
</compile_context>

<pallas_src>
import jax
import jax.numpy as jnp
import numpy as np
from jax.experimental import pallas as pl
from jax.experimental.pallas import tpu as pltpu

DROPOUT_P = 0.6
KEEP_P = 1.0 - DROPOUT_P


def _round_up(x, m):
    return (x + m - 1) // m * m


def mf_kernel(uid_ref, iid_ref,            # scalar prefetch (SMEM), length Bp
              scale_ref,                   # (1, TB) f32 dropout scale (VMEM)
              uw_hbm, iw_hbm,              # embedding tables, HBM (pl.ANY)
              uf_ref, if_ref, ratings_ref, # outputs: (TB,D), (TB,D), (1,TB)
              ubuf, ibuf, sem):            # scratch: VMEM (TB,D) x2, DMA sems (2,)
    t = pl.program_id(0)
    tb = ubuf.shape[0]
    base = t * tb

    # Issue all 2*TB row-gather DMAs for this tile before waiting, so many
    # random-row HBM transfers are in flight concurrently.
    @pl.loop(0, tb)
    def _issue_row(r):
        u_row = uid_ref[base + r]
        i_row = iid_ref[base + r]
        pltpu.make_async_copy(uw_hbm.at[u_row], ubuf.at[r], sem.at[0]).start()
        pltpu.make_async_copy(iw_hbm.at[i_row], ibuf.at[r], sem.at[1]).start()

    # Wait for every row copy (all copies of a table share one semaphore; each
    # wait descriptor has the same per-row shape as the matching start).
    @pl.loop(0, tb)
    def _wait_row(r):
        pltpu.make_async_copy(uw_hbm.at[0], ubuf.at[0], sem.at[0]).wait()
        pltpu.make_async_copy(iw_hbm.at[0], ibuf.at[0], sem.at[1]).wait()

    u_raw = ubuf[...]                       # (TB, D), storage dtype
    v_raw = ibuf[...]

    # Pass-through F.embedding outputs (full sublane-dense blocks).
    uf_ref[...] = u_raw
    if_ref[...] = v_raw

    # (user_features * item_features).sum(dim=1), f32 accumulation on VPU+XLU.
    prod = u_raw.astype(jnp.float32) * v_raw.astype(jnp.float32)
    rat = jnp.sum(prod, axis=1)             # (TB,)

    # Inverted dropout: scale is 0.0 (dropped) or 1/0.4 (kept).  Lane-dense
    # (1, TB) store -> single unmasked vst per tile.
    ratings_ref[...] = (rat * scale_ref[0, :]).reshape(1, tb)


def matrix_factorization(user_ids, item_ids, params, *, dropout_key=None,
                         tile_b=None):
    user_w = params["user_weight"]
    item_w = params["item_weight"]
    B = user_ids.shape[0]
    D = user_w.shape[1]

    # Tile size: multiple of 128 (lane-dense ratings row, sublane-dense for
    # f32/bf16 feature blocks).
    if tile_b is None:
        tile_b = 256 if B > 128 else 128
    TB = max(128, _round_up(tile_b, 128))
    Bp = _round_up(B, TB)
    nt = Bp // TB

    if dropout_key is None:
        dropout_key = jax.random.PRNGKey(0)
    # TODO(synk): RNG stream differs from torch's F.dropout (semantics match:
    # iid Bernoulli keep-mask p_keep=0.4, inverted-dropout scale 1/0.4,
    # training mode as in the reference module).
    keep = jax.random.bernoulli(dropout_key, KEEP_P, (B,))
    scale = jnp.where(keep, jnp.float32(1.0 / KEEP_P), jnp.float32(0.0))
    scale = jnp.pad(scale, (0, Bp - B)).reshape(nt, TB)

    # Pad ids with 0 (a valid row) so padded-row gathers never go OOB.
    uid = jnp.pad(user_ids.astype(jnp.int32), (0, Bp - B))
    iid = jnp.pad(item_ids.astype(jnp.int32), (0, Bp - B))

    grid_spec = pltpu.PrefetchScalarGridSpec(
        num_scalar_prefetch=2,                 # user_ids, item_ids -> SMEM
        grid=(nt,),
        in_specs=[
            pl.BlockSpec((1, TB), lambda t, u, i: (t, 0)),   # dropout scale
            pl.BlockSpec(memory_space=pl.ANY),               # user table (HBM)
            pl.BlockSpec(memory_space=pl.ANY),               # item table (HBM)
        ],
        out_specs=(
            pl.BlockSpec((TB, D), lambda t, u, i: (t, 0)),   # user_features
            pl.BlockSpec((TB, D), lambda t, u, i: (t, 0)),   # item_features
            pl.BlockSpec((1, TB), lambda t, u, i: (t, 0)),   # ratings (lane-dense)
        ),
        scratch_shapes=[
            pltpu.VMEM((TB, D), user_w.dtype),
            pltpu.VMEM((TB, D), item_w.dtype),
            pltpu.SemaphoreType.DMA((2,)),
        ],
    )

    itemsize = jnp.dtype(user_w.dtype).itemsize
    cost = pl.CostEstimate(
        flops=2 * Bp * D,
        transcendentals=0,
        bytes_accessed=int(4 * Bp * D * itemsize + 2 * Bp * 4),
    )

    uf, itf, ratings2d = pl.pallas_call(
        mf_kernel,
        grid_spec=grid_spec,
        out_shape=(
            jax.ShapeDtypeStruct((Bp, D), user_w.dtype),     # user_features
            jax.ShapeDtypeStruct((Bp, D), item_w.dtype),     # item_features
            jax.ShapeDtypeStruct((nt, TB), jnp.float32),     # ratings rows
        ),
        compiler_params=pltpu.CompilerParams(
            dimension_semantics=("parallel",)),
        cost_estimate=cost,
    )(uid, iid, scale, user_w, item_w)

    ratings = ratings2d.reshape(-1)[:B]
    return ratings, uf[:B], itf[:B]


if __name__ == "__main__":
    key = jax.random.PRNGKey(0)
    k_uw, k_iw, k_uid, k_iid, k_drop = jax.random.split(key, 5)

    NUM_USERS, NUM_ITEMS, D, B = 16, 16, 32, 8

    params = {
        "user_weight": jax.random.normal(k_uw, (NUM_USERS, D), dtype=jnp.float32),
        "item_weight": jax.random.normal(k_iw, (NUM_ITEMS, D), dtype=jnp.float32),
    }
    user_ids = jax.random.randint(k_uid, (B,), 0, NUM_USERS, dtype=jnp.int32)
    item_ids = jax.random.randint(k_iid, (B,), 0, NUM_ITEMS, dtype=jnp.int32)

    ratings, uf, itf = matrix_factorization(user_ids, item_ids, params,
                                            dropout_key=k_drop)
    jax.block_until_ready((ratings, uf, itf))

    # Sanity checks: embedding gather + dropout structure.
    ref_uf = params["user_weight"][user_ids]
    ref_if = params["item_weight"][item_ids]
    np.testing.assert_allclose(np.asarray(uf), np.asarray(ref_uf), rtol=1e-6)
    np.testing.assert_allclose(np.asarray(itf), np.asarray(ref_if), rtol=1e-6)

    ref_dot = np.sum(np.asarray(ref_uf) * np.asarray(ref_if), axis=1)
    r = np.asarray(ratings)
    scale = 1.0 / KEEP_P
    ok = np.all(np.isclose(r, 0.0, atol=1e-6) |
                np.isclose(r, ref_dot * scale, rtol=1e-4, atol=1e-4))
    assert bool(ok), "dropout output must be 0 or scaled dot-product"
    assert r.shape == (B,)

    print("KERNEL_OK")
</pallas_src>

<mosaic_0001>
module attributes {stable_mosaic.version = 11 : i64} {
  func.func @mf_kernel(%arg0: i32, %arg1: memref<128xi32, #tpu.memory_space<smem>>, %arg2: memref<128xi32, #tpu.memory_space<smem>>, %arg3: memref<1x128xf32, #tpu.memory_space<vmem>>, %arg4: memref<16x32xf32, #tpu.memory_space<any>>, %arg5: memref<16x32xf32, #tpu.memory_space<any>>, %arg6: memref<128x32xf32, #tpu.memory_space<vmem>>, %arg7: memref<128x32xf32, #tpu.memory_space<vmem>>, %arg8: memref<1x128xf32, #tpu.memory_space<vmem>>, %arg9: memref<128x32xf32, #tpu.memory_space<vmem>>, %arg10: memref<128x32xf32, #tpu.memory_space<vmem>>, %arg11: memref<2x!tpu.dma_semaphore, #tpu.memory_space<semaphore_mem>>) attributes {dimension_semantics = [#tpu.dimension_semantics<parallel>], iteration_bounds = array<i64: 1>, scalar_prefetch = 2 : i64, scratch_operands = 3 : i64, tpu.core_type = #tpu.core_type<tc>, window_params = [{transform_indices = @transform_0, window_bounds = array<i64: 1, 128>}, {}, {}, {transform_indices = @transform_3, window_bounds = array<i64: 128, 32>}, {transform_indices = @transform_4, window_bounds = array<i64: 128, 32>}, {transform_indices = @transform_5, window_bounds = array<i64: 1, 128>}]} {
    %c128_i32 = arith.constant 128 : i32
    %0 = arith.muli %arg0, %c128_i32 : i32
    %c0_i32 = arith.constant 0 : i32
    %c128_i32_0 = arith.constant 128 : i32
    %1 = arith.addi %c0_i32, %c128_i32_0 : i32
    %c1_i32 = arith.constant 1 : i32
    scf.for %arg12 = %c0_i32 to %1 step %c1_i32  : i32 {
      %c1_i32_16 = arith.constant 1 : i32
      %14 = arith.muli %arg12, %c1_i32_16 : i32
      %c0_i32_17 = arith.constant 0 : i32
      %15 = arith.addi %c0_i32_17, %14 : i32
      %16 = arith.addi %0, %15 : i32
      %17 = arith.index_cast %16 : i32 to index
      %18 = memref.load %arg1[%17] : memref<128xi32, #tpu.memory_space<smem>>
      %19 = arith.addi %0, %15 : i32
      %20 = arith.index_cast %19 : i32 to index
      %21 = memref.load %arg2[%20] : memref<128xi32, #tpu.memory_space<smem>>
      %c0_i32_18 = arith.constant 0 : i32
      %c0_i32_19 = arith.constant 0 : i32
      %22 = tpu.memref_slice %arg4[%18, %c0_i32_19] : memref<16x32xf32, #tpu.memory_space<any>> -> memref<1x32xf32, #tpu.memory_space<any>>
      %23 = tpu.memref_squeeze %22 : memref<1x32xf32, #tpu.memory_space<any>> -> memref<32xf32, #tpu.memory_space<any>>
      %c0_i32_20 = arith.constant 0 : i32
      %24 = tpu.memref_slice %arg9[%15, %c0_i32_20] : memref<128x32xf32, #tpu.memory_space<vmem>> -> memref<1x32xf32, #tpu.memory_space<vmem>>
      %25 = tpu.memref_squeeze %24 : memref<1x32xf32, #tpu.memory_space<vmem>> -> memref<32xf32, #tpu.memory_space<vmem>>
      %26 = tpu.memref_slice %arg11[%c0_i32_18] : memref<2x!tpu.dma_semaphore, #tpu.memory_space<semaphore_mem>> -> memref<1x!tpu.dma_semaphore, #tpu.memory_space<semaphore_mem>>
      %27 = tpu.memref_squeeze %26 : memref<1x!tpu.dma_semaphore, #tpu.memory_space<semaphore_mem>> -> memref<!tpu.dma_semaphore, #tpu.memory_space<semaphore_mem>>
      tpu.enqueue_dma source(%23 : memref<32xf32, #tpu.memory_space<any>>) target(%25 : memref<32xf32, #tpu.memory_space<vmem>>) target_semaphore(%27 : memref<!tpu.dma_semaphore, #tpu.memory_space<semaphore_mem>>)
      %c1_i32_21 = arith.constant 1 : i32
      %c0_i32_22 = arith.constant 0 : i32
      %28 = tpu.memref_slice %arg5[%21, %c0_i32_22] : memref<16x32xf32, #tpu.memory_space<any>> -> memref<1x32xf32, #tpu.memory_space<any>>
      %29 = tpu.memref_squeeze %28 : memref<1x32xf32, #tpu.memory_space<any>> -> memref<32xf32, #tpu.memory_space<any>>
      %c0_i32_23 = arith.constant 0 : i32
      %30 = tpu.memref_slice %arg10[%15, %c0_i32_23] : memref<128x32xf32, #tpu.memory_space<vmem>> -> memref<1x32xf32, #tpu.memory_space<vmem>>
      %31 = tpu.memref_squeeze %30 : memref<1x32xf32, #tpu.memory_space<vmem>> -> memref<32xf32, #tpu.memory_space<vmem>>
      %32 = tpu.memref_slice %arg11[%c1_i32_21] : memref<2x!tpu.dma_semaphore, #tpu.memory_space<semaphore_mem>> -> memref<1x!tpu.dma_semaphore, #tpu.memory_space<semaphore_mem>>
      %33 = tpu.memref_squeeze %32 : memref<1x!tpu.dma_semaphore, #tpu.memory_space<semaphore_mem>> -> memref<!tpu.dma_semaphore, #tpu.memory_space<semaphore_mem>>
      tpu.enqueue_dma source(%29 : memref<32xf32, #tpu.memory_space<any>>) target(%31 : memref<32xf32, #tpu.memory_space<vmem>>) target_semaphore(%33 : memref<!tpu.dma_semaphore, #tpu.memory_space<semaphore_mem>>)
    }
    %c128_i32_1 = arith.constant 128 : i32
    %c0_i32_2 = arith.constant 0 : i32
    %c128_i32_3 = arith.constant 128 : i32
    %2 = arith.addi %c0_i32_2, %c128_i32_3 : i32
    %c1_i32_4 = arith.constant 1 : i32
    scf.for %arg12 = %c0_i32_2 to %2 step %c1_i32_4  : i32 {
      %c0_i32_16 = arith.constant 0 : i32
      %c0_i32_17 = arith.constant 0 : i32
      %c0_i32_18 = arith.constant 0 : i32
      %c0_i32_19 = arith.constant 0 : i32
      %14 = tpu.memref_slice %arg4[%c0_i32_16, %c0_i32_19] : memref<16x32xf32, #tpu.memory_space<any>> -> memref<1x32xf32, #tpu.memory_space<any>>
      %15 = tpu.memref_squeeze %14 : memref<1x32xf32, #tpu.memory_space<any>> -> memref<32xf32, #tpu.memory_space<any>>
      %c0_i32_20 = arith.constant 0 : i32
      %16 = tpu.memref_slice %arg9[%c0_i32_17, %c0_i32_20] : memref<128x32xf32, #tpu.memory_space<vmem>> -> memref<1x32xf32, #tpu.memory_space<vmem>>
      %17 = tpu.memref_squeeze %16 : memref<1x32xf32, #tpu.memory_space<vmem>> -> memref<32xf32, #tpu.memory_space<vmem>>
      %18 = tpu.memref_slice %arg11[%c0_i32_18] : memref<2x!tpu.dma_semaphore, #tpu.memory_space<semaphore_mem>> -> memref<1x!tpu.dma_semaphore, #tpu.memory_space<semaphore_mem>>
      %19 = tpu.memref_squeeze %18 : memref<1x!tpu.dma_semaphore, #tpu.memory_space<semaphore_mem>> -> memref<!tpu.dma_semaphore, #tpu.memory_space<semaphore_mem>>
      tpu.wait_dma2 semaphore(%19 : memref<!tpu.dma_semaphore, #tpu.memory_space<semaphore_mem>>) src(%15 : memref<32xf32, #tpu.memory_space<any>>) dst(%17 : memref<32xf32, #tpu.memory_space<vmem>>)
      %c0_i32_21 = arith.constant 0 : i32
      %c0_i32_22 = arith.constant 0 : i32
      %c1_i32_23 = arith.constant 1 : i32
      %c0_i32_24 = arith.constant 0 : i32
      %20 = tpu.memref_slice %arg5[%c0_i32_21, %c0_i32_24] : memref<16x32xf32, #tpu.memory_space<any>> -> memref<1x32xf32, #tpu.memory_space<any>>
      %21 = tpu.memref_squeeze %20 : memref<1x32xf32, #tpu.memory_space<any>> -> memref<32xf32, #tpu.memory_space<any>>
      %c0_i32_25 = arith.constant 0 : i32
      %22 = tpu.memref_slice %arg10[%c0_i32_22, %c0_i32_25] : memref<128x32xf32, #tpu.memory_space<vmem>> -> memref<1x32xf32, #tpu.memory_space<vmem>>
      %23 = tpu.memref_squeeze %22 : memref<1x32xf32, #tpu.memory_space<vmem>> -> memref<32xf32, #tpu.memory_space<vmem>>
      %24 = tpu.memref_slice %arg11[%c1_i32_23] : memref<2x!tpu.dma_semaphore, #tpu.memory_space<semaphore_mem>> -> memref<1x!tpu.dma_semaphore, #tpu.memory_space<semaphore_mem>>
      %25 = tpu.memref_squeeze %24 : memref<1x!tpu.dma_semaphore, #tpu.memory_space<semaphore_mem>> -> memref<!tpu.dma_semaphore, #tpu.memory_space<semaphore_mem>>
      tpu.wait_dma2 semaphore(%25 : memref<!tpu.dma_semaphore, #tpu.memory_space<semaphore_mem>>) src(%21 : memref<32xf32, #tpu.memory_space<any>>) dst(%23 : memref<32xf32, #tpu.memory_space<vmem>>)
    }
    %c0 = arith.constant 0 : index
    %c0_5 = arith.constant 0 : index
    %3 = vector.load %arg9[%c0, %c0_5] : memref<128x32xf32, #tpu.memory_space<vmem>>, vector<128x32xf32>
    %c0_6 = arith.constant 0 : index
    %c0_7 = arith.constant 0 : index
    %4 = vector.load %arg10[%c0_6, %c0_7] : memref<128x32xf32, #tpu.memory_space<vmem>>, vector<128x32xf32>
    %c0_8 = arith.constant 0 : index
    %c0_9 = arith.constant 0 : index
    %5 = vector.load %arg6[%c0_8, %c0_9] : memref<128x32xf32, #tpu.memory_space<vmem>>, vector<128x32xf32>
    tpu.vector_store %arg6[%c0_8, %c0_9], %3 {strides = array<i32>} : memref<128x32xf32, #tpu.memory_space<vmem>>, vector<128x32xf32>,
    %c0_10 = arith.constant 0 : index
    %c0_11 = arith.constant 0 : index
    %6 = vector.load %arg7[%c0_10, %c0_11] : memref<128x32xf32, #tpu.memory_space<vmem>>, vector<128x32xf32>
    tpu.vector_store %arg7[%c0_10, %c0_11], %4 {strides = array<i32>} : memref<128x32xf32, #tpu.memory_space<vmem>>, vector<128x32xf32>,
    %7 = arith.mulf %3, %4 : vector<128x32xf32>
    %cst = arith.constant dense<0.000000e+00> : vector<128xf32>
    %8 = vector.multi_reduction <add>, %7, %cst [1] : vector<128x32xf32> to vector<128xf32>
    %c0_12 = arith.constant 0 : index
    %c0_13 = arith.constant 0 : index
    %9 = vector.load %arg3[%c0_12, %c0_13] : memref<1x128xf32, #tpu.memory_space<vmem>>, vector<1x128xf32>
    %10 = vector.shape_cast %9 : vector<1x128xf32> to vector<128xf32>
    %11 = arith.mulf %8, %10 : vector<128xf32>
    %12 = vector.shape_cast %11 : vector<128xf32> to vector<1x128xf32>
    %c0_14 = arith.constant 0 : index
    %c0_15 = arith.constant 0 : index
    %13 = vector.load %arg8[%c0_14, %c0_15] : memref<1x128xf32, #tpu.memory_space<vmem>>, vector<1x128xf32>
    tpu.vector_store %arg8[%c0_14, %c0_15], %12 {strides = array<i32>} : memref<1x128xf32, #tpu.memory_space<vmem>>, vector<1x128xf32>,
    return
  }
  func.func @transform_0(%arg0: i32, %arg1: memref<128xi32, #tpu.memory_space<smem>>, %arg2: memref<128xi32, #tpu.memory_space<smem>>) -> (i32, i32) {
    %c0_i32 = arith.constant 0 : i32
    %c0_i32_0 = arith.constant 0 : i32
    return %arg0, %c0_i32 : i32, i32
  }
  func.func @transform_3(%arg0: i32, %arg1: memref<128xi32, #tpu.memory_space<smem>>, %arg2: memref<128xi32, #tpu.memory_space<smem>>) -> (i32, i32) {
    %c0_i32 = arith.constant 0 : i32
    %c0_i32_0 = arith.constant 0 : i32
    return %arg0, %c0_i32 : i32, i32
  }
  func.func @transform_4(%arg0: i32, %arg1: memref<128xi32, #tpu.memory_space<smem>>, %arg2: memref<128xi32, #tpu.memory_space<smem>>) -> (i32, i32) {
    %c0_i32 = arith.constant 0 : i32
    %c0_i32_0 = arith.constant 0 : i32
    return %arg0, %c0_i32 : i32, i32
  }
  func.func @transform_5(%arg0: i32, %arg1: memref<128xi32, #tpu.memory_space<smem>>, %arg2: memref<128xi32, #tpu.memory_space<smem>>) -> (i32, i32) {
    %c0_i32 = arith.constant 0 : i32
    %c0_i32_0 = arith.constant 0 : i32
    return %arg0, %c0_i32 : i32, i32
  }
}

</mosaic_0001>

<bundles_post_ra>
// kernel: tpu_custom_call.1
= control target key start
LH: loop header
LB: loop body
LE: loop exit
PB: predicated region body
PF: predicated region fallthrough
CT: control target
= control target key end

     0   :  { %s970_s0 = inlined_call_operand.hbm [shape: s32[128], index: 0, kind: input, shape index: {}]   ;;  %s971_s2 = inlined_call_operand.vmem [shape: f32[1,128], index: 2, kind: input, shape index: {}]   ;;  %s972_s3 = inlined_call_operand.hbm [shape: f32[16,32], index: 3, kind: input, shape index: {}]   ;;  %s973_s4 = inlined_call_operand.hbm [shape: f32[16,32], index: 4, kind: input, shape index: {}]   ;;  %s974_s5 = inlined_call_operand.vmem [shape: f32[128,32], index: 5, kind: output, shape index: {0}]   ;;  %s975_s6 = inlined_call_operand.vmem [shape: f32[128,32], index: 6, kind: output, shape index: {1}]   ;;  %s976_s7 = inlined_call_operand.hbm [shape: f32[1,128], index: 7, kind: output, shape index: {2}]   ;;  %s977_s1 = inlined_call_operand.vmem [shape: s32[128], index: 1, kind: input, shape index: {}]  }
   0x1   :  { %s559_s26 = scalar_lea.hbm %s970_s0, 16 }
   0x2   :  { %p560_p0 = scmp.ne.s32.totalorder %s970_s0, %s559_s26  ;;  %p563_p1 = scmp.lt.u32.totalorder %s559_s26, %s970_s0 }
   0x4   :  { %p565_p2 = pnand %p563_p1, %p560_p0 }
   0x6   :  { %568 = shalt.err (!%p565_p2)  }
   0x7   :  { %s675_s8 = smov [#allocation6]   ;;  %s15_s13 = sshll.u32 %s977_s1, 4  ;;  %s16_s13 = int_to_ptr.vmem [resolvable:$true] %s15_s13 }
   0x8   :  { %14 = dma.hbm_to_smem %s970_s0, 16, %s675_s8, [#allocation5] }
   0x9   :  { %s569_s14 = scalar_lea.vmem %s16_s13, 16  ;;  %p574_p4 = scmp.lt.s32.totalorder %s16_s13, %s16_s13 }
   0xa   :  { %p570_p3 = scmp.ne.s32.totalorder %s16_s13, %s569_s14  ;;  %p575_p5 = scmp.lt.s32.totalorder %s569_s14, %s569_s14 }
   0xc   :  { %p576_p6 = por %p575_p5, %p574_p4 }
   0xe   :  { %p577_p7 = pnand %p576_p6, %p570_p3 }
  0x10   :  { %580 = shalt.err (!%p577_p7)  }
  0x11   :  { %s676_s15 = smov [#allocation7]  }
  0x12   :  { %18 = dma.vmem_to_smem %s16_s13, 16, %s676_s15, [#allocation5] }
  0x13   :  { %659 = dma.done.wait [#allocation5], 32 }
  0x14   :  { %660 = vsyncadd [#allocation5], 4294967264 }
  0x15   :  { %20 = sfence }
  0x16   :  { %21 = vsyncpa [#allocation9], 0  ;;  %s736_s16 = smov 0  }
  0x17 LB: > { %s32_s0 = sld [smem:[#allocation6 + %s669_s16]]  ;;  %s36_s17 = scalar_lea.vmem [#allocation2], %s669_s16  ;;  %s669_s16 = sphi %s736_s16, %s30_s16  }
  0x18   : > { %s743_s1 = sld [smem:[#allocation7 + %s669_s16]]  ;;  %s44_s18 = sshll.u32 %s36_s17, 4  ;;  %s45_s18 = int_to_ptr.vmem [resolvable:$true] %s44_s18 }
  0x19   : > { %s50_s19 = scalar_lea.vmem [#allocation3], %s669_s16  ;;  %s583_s29 = scalar_lea.hbm %s972_s3, 256 }
  0x1a   : > { %s59_s20 = sshll.u32 %s50_s19, 4  ;;  %s747_s20 = int_to_ptr.vmem [resolvable:$true] %s59_s20 }
  0x1d   : > { %s532_s21 = sshll.u32 %s32_s0, 4 }
  0x1e   : > { %s35_s24 = scalar_lea.hbm %s972_s3, %s532_s21  ;;  %s533_s25 = sshll.u32 %s743_s1, 4 }
  0x1f   : > { %s581_s26 = scalar_lea.hbm %s35_s24, 16  ;;  %p584_p9 = scmp.lt.u32.totalorder %s35_s24, %s972_s3 }
  0x20   : > { %p582_p8 = scmp.ne.s32.totalorder %s35_s24, %s581_s26  ;;  %p585_p10 = scmp.lt.u32.totalorder %s583_s29, %s581_s26 }
  0x21   : > { %p587_p12 = scmp.lt.u32.totalorder %s581_s26, %s35_s24 }
  0x22   : > { %p586_p11 = por %p585_p10, %p584_p9 }
  0x24   : > { %p588_p13 = por %p587_p12, %p586_p11 }
  0x26   : > { %p589_p0 = pnand %p588_p13, %p582_p8 }
  0x28   : > { %592 = shalt.err (!%p589_p0)  }
  0x29   : > { %s593_s9 = scalar_lea.vmem %s45_s18, 16  ;;  %s677_s10 = smov [#allocation2]  }
  0x2a   : > { %p594_p1 = scmp.ne.s32.totalorder %s45_s18, %s593_s9  ;;  %s595_s11 = sshll.u32 %s677_s10, 4  ;;  %s596_s11 = int_to_ptr.vmem [resolvable:$false] %s595_s11 }
  0x2b   : > { %s597_s12 = scalar_lea.vmem %s596_s11, 2048  ;;  %p598_p2 = scmp.lt.s32.totalorder %s45_s18, %s596_s11 }
  0x2c   : > { %p599_p3 = scmp.lt.s32.totalorder %s597_s12, %s593_s9 }
  0x2e   : > { %p600_p4 = por %p599_p3, %p598_p2 }
  0x30   : > { %p601_p5 = pnand %p600_p4, %p594_p1 }
  0x32   : > { %604 = shalt.err (!%p601_p5)  }
  0x33   : > { %47 = dma.hbm_to_vmem [thread:$0]  %s35_s24, 16, %s45_s18, [#allocation4] }
  0x34   : > { %s49_s15 = scalar_lea.hbm %s973_s4, %s533_s25  ;;  %s607_s19 = scalar_lea.hbm %s973_s4, 256 }
  0x35   : > { %s605_s0 = scalar_lea.hbm %s49_s15, 16  ;;  %p608_p7 = scmp.lt.u32.totalorder %s49_s15, %s973_s4 }
  0x36   : > { %p606_p6 = scmp.ne.s32.totalorder %s49_s15, %s605_s0  ;;  %p609_p8 = scmp.lt.u32.totalorder %s607_s19, %s605_s0 }
  0x37   : > { %p611_p10 = scmp.lt.u32.totalorder %s605_s0, %s49_s15 }
  0x38   : > { %p610_p9 = por %p609_p8, %p608_p7 }
  0x3a   : > { %p612_p11 = por %p611_p10, %p610_p9 }
  0x3c   : > { %p613_p12 = pnand %p612_p11, %p606_p6 }
  0x3e   : > { %616 = shalt.err (!%p613_p12)  }
  0x3f   : > { %s617_s18 = scalar_lea.vmem %s747_s20, 16  ;;  %s678_s23 = smov [#allocation3]  }
  0x40   : > { %p618_p13 = scmp.ne.s32.totalorder %s747_s20, %s617_s18  ;;  %s619_s24 = sshll.u32 %s678_s23, 4  ;;  %s620_s24 = int_to_ptr.vmem [resolvable:$false] %s619_s24 }
  0x41   : > { %s621_s25 = scalar_lea.vmem %s620_s24, 2048  ;;  %p622_p0 = scmp.lt.s32.totalorder %s747_s20, %s620_s24 }
  0x42   : > { %p623_p1 = scmp.lt.s32.totalorder %s621_s25, %s617_s18 }
  0x44   : > { %p624_p2 = por %p623_p1, %p622_p0 }
  0x46   : > { %p625_p3 = pnand %p624_p2, %p618_p13 }
  0x48   : > { %628 = shalt.err (!%p625_p3)  }
  0x49   : > { %62 = dma.hbm_to_vmem [thread:$0]  %s49_s15, 16, %s747_s20, [#allocation4 + $0x1] }
  0x4a   : > { %s30_s16 = sadd.s32 1, %s669_s16  }
  0x4b   : > { %p27_p4 = scmp.ge.s32.totalorder %s30_s16, 128  }
  0x4c   :  { %s671_s26 = smov (%p27_p4), 0  }
  0x4d   :  { %29 = sbr.rel (!%p27_p4) target bundleno = 23 (0x17), region = 69 }
  0x54 LB: > { %661 = dma.done.wait [#allocation4], 16  ;;  %s673_s26 = sphi %s671_s26, %s68_s26  }
  0x55   : > { %662 = vsyncadd [#allocation4], 4294967280 }
  0x56   : > { %663 = dma.done.wait [#allocation4 + $0x1], 16 }
  0x57   : > { %664 = vsyncadd [#allocation4 + $0x1], 4294967280  ;;  %s68_s26 = sadd.s32 1, %s673_s26  }
  0x58   : > { %p65_p5 = scmp.ge.s32.totalorder %s68_s26, 128  }
  0x59   :  { %v76_v0 = vld [vmem:[#allocation2 + $0x10] sm:$0xff] (%p65_p5)  ;;  %vm106_vm0 = vcmask (%p65_p5), 261120   ;;  %v74_v2 = vld [vmem:[#allocation2] sm:$0xff] (%p65_p5)  ;;  %v77_v5 = vld [vmem:[#allocation2 + $0x18] sm:$0xff] (%p65_p5)  ;;  %vm379_vm1 = vcmask (%p65_p5), 130112   ;;  %vm386_vm2 = vcmask (%p65_p5), 195712  }
  0x5a   :  { %67 = sbr.rel (!%p65_p5) target bundleno = 84 (0x54), region = 80  ;;  %v92_v1 = vld [vmem:[#allocation3 + $0x10] sm:$0xff] (%p65_p5)  ;;  %109 = vst.msk [vmem:[%s974_s5 + $0x10] sm:$0xff] (%p65_p5), %vm106_vm0, %v76_v0  ;;  %v90_v4 = vld [vmem:[#allocation3] sm:$0xff] (%p65_p5)  ;;  %107 = vst.msk [vmem:[%s974_s5] sm:$0xff] (%p65_p5), %vm106_vm0, %v74_v2  ;;  %vm393_vm3 = vcmask (%p65_p5), 261312  }
  0x5b   :  { %125 = vst.msk [vmem:[%s975_s6 + $0x10] sm:$0xff] (%p65_p5), %vm106_vm0, %v92_v1  ;;  %v141_v3 = vmul.f32 (%p65_p5), %v92_v1, %v76_v0  ;;  %v93_v6 = vld [vmem:[#allocation3 + $0x18] sm:$0xff] (%p65_p5)  ;;  %123 = vst.msk [vmem:[%s975_s6] sm:$0xff] (%p65_p5), %vm106_vm0, %v90_v4  ;;  %v139_v7 = vmul.f32 (%p65_p5), %v90_v4, %v74_v2  ;;  %v75_v9 = vld [vmem:[#allocation2 + $0x8] sm:$0xff] (%p65_p5)  ;;  %v679_v1 = vmov (%p65_p5), 0   ;;  %vm400_vm4 = vcmask (%p65_p5), 326912  }
  0x5c   :  { %110 = vst.msk [vmem:[%s974_s5 + $0x18] sm:$0xff] (%p65_p5), %vm106_vm0, %v77_v5  ;;  %126 = vst.msk [vmem:[%s975_s6 + $0x18] sm:$0xff] (%p65_p5), %vm106_vm0, %v93_v6  ;;  %v142_v8 = vmul.f32 (%p65_p5), %v93_v6, %v77_v5  ;;  %v91_v10 = vld [vmem:[#allocation3 + $0x8] sm:$0xff] (%p65_p5)  ;;  %v78_v15 = vld [vmem:[#allocation2 + $0x20] sm:$0xff] (%p65_p5)  ;;  %558 = vset.pattern.permute.xlu1 (%p65_p5), %v679_v1  ;;  %557 = vset.pattern.permute.xlu0 (%p65_p5), %v679_v1  ;;  %vm407_vm5 = vcmask (%p65_p5), 392512   ;;  %vm414_vm6 = vcmask (%p65_p5), 458112  }
  0x5d   :  { %v79_v11 = vld [vmem:[#allocation2 + $0x28] sm:$0xff] (%p65_p5)  ;;  %v161_v12 = vsel (%p65_p5), %vm106_vm0, %v141_v3, 0.0  ;;  %108 = vst.msk [vmem:[%s974_s5 + $0x8] sm:$0xff] (%p65_p5), %vm106_vm0, %v75_v9  ;;  %124 = vst.msk [vmem:[%s975_s6 + $0x8] sm:$0xff] (%p65_p5), %vm106_vm0, %v91_v10  ;;  %v140_v13 = vmul.f32 (%p65_p5), %v91_v10, %v75_v9  ;;  %v94_v16 = vld [vmem:[#allocation3 + $0x20] sm:$0xff] (%p65_p5)  ;;  %v155_v17 = vsel (%p65_p5), %vm106_vm0, %v139_v7, 0.0 }
  0x5e   :  { %v95_v14 = vld [vmem:[#allocation3 + $0x28] sm:$0xff] (%p65_p5)  ;;  %112 = vst.msk [vmem:[%s974_s5 + $0x28] sm:$0xff] (%p65_p5), %vm106_vm0, %v79_v11  ;;  %162 = vadd.xlane.f32.xlu1 (%p65_p5), %v161_v12  ;;  %111 = vst.msk [vmem:[%s974_s5 + $0x20] sm:$0xff] (%p65_p5), %vm106_vm0, %v78_v15  ;;  %v81_v18 = vld [vmem:[#allocation2 + $0x38] sm:$0xff] (%p65_p5)  ;;  %156 = vadd.xlane.f32.xlu0 (%p65_p5), %v155_v17  ;;  %v164_v21 = vsel (%p65_p5), %vm106_vm0, %v142_v8, 0.0  ;;  %v143_v27 = vmul.f32 (%p65_p5), %v94_v16, %v78_v15  ;;  %vm421_vm7 = vcmask (%p65_p5), 523712  }
  0x5f   :  { %128 = vst.msk [vmem:[%s975_s6 + $0x28] sm:$0xff] (%p65_p5), %vm106_vm0, %v95_v14  ;;  %127 = vst.msk [vmem:[%s975_s6 + $0x20] sm:$0xff] (%p65_p5), %vm106_vm0, %v94_v16  ;;  %v97_v19 = vld [vmem:[#allocation3 + $0x38] sm:$0xff] (%p65_p5)  ;;  %v80_v20 = vld [vmem:[#allocation2 + $0x30] sm:$0xff] (%p65_p5)  ;;  %v144_v22 = vmul.f32 (%p65_p5), %v95_v14, %v79_v11  ;;  %v158_v26 = vsel (%p65_p5), %vm106_vm0, %v140_v13, 0.0  ;;  %vm428_vm8 = vcmask (%p65_p5), 589312  }
  0x60   :  { %114 = vst.msk [vmem:[%s974_s5 + $0x38] sm:$0xff] (%p65_p5), %vm106_vm0, %v81_v18  ;;  %130 = vst.msk [vmem:[%s975_s6 + $0x38] sm:$0xff] (%p65_p5), %vm106_vm0, %v97_v19  ;;  %v96_v23 = vld [vmem:[#allocation3 + $0x30] sm:$0xff] (%p65_p5)  ;;  %v83_v24 = vld [vmem:[#allocation2 + $0x48] sm:$0xff] (%p65_p5)  ;;  %v146_v38 = vmul.f32 (%p65_p5), %v97_v19, %v81_v18  ;;  %v167_v42 = vsel (%p65_p5), %vm106_vm0, %v143_v27, 0.0  ;;  %vm435_vm9 = vcmask (%p65_p5), 654912  }
  0x61   :  { %113 = vst.msk [vmem:[%s974_s5 + $0x30] sm:$0xff] %vm106_vm0, %v80_v20  ;;  %v99_v25 = vld [vmem:[#allocation3 + $0x48] sm:$0xff]  ;;  %129 = vst.msk [vmem:[%s975_s6 + $0x30] sm:$0xff] %vm106_vm0, %v96_v23  ;;  %v82_v28 = vld [vmem:[#allocation2 + $0x40] sm:$0xff]  ;;  %v170_v37 = vsel %vm106_vm0, %v144_v22, 0.0  ;;  %v145_v43 = vmul.f32 %v96_v23, %v80_v20  ;;  %vm442_vm10 = vcmask 720512  }
  0x62   :  { %116 = vst.msk [vmem:[%s974_s5 + $0x48] sm:$0xff] %vm106_vm0, %v83_v24  ;;  %132 = vst.msk [vmem:[%s975_s6 + $0x48] sm:$0xff] %vm106_vm0, %v99_v25  ;;  %v98_v29 = vld [vmem:[#allocation3 + $0x40] sm:$0xff]  ;;  %v85_v30 = vld [vmem:[#allocation2 + $0x58] sm:$0xff]  ;;  %165 = vadd.xlane.f32.xlu1 %v164_v21  ;;  %159 = vadd.xlane.f32.xlu0 %v158_v26  ;;  %v176_v46 = vsel %vm106_vm0, %v146_v38, 0.0  ;;  %v148_v47 = vmul.f32 %v99_v25, %v83_v24  ;;  %vm449_vm11 = vcmask 786112  }
  0x63   :  { %115 = vst.msk [vmem:[%s974_s5 + $0x40] sm:$0xff] %vm106_vm0, %v82_v28  ;;  %131 = vst.msk [vmem:[%s975_s6 + $0x40] sm:$0xff] %vm106_vm0, %v98_v29  ;;  %v101_v31 = vld [vmem:[#allocation3 + $0x58] sm:$0xff]  ;;  %v84_v32 = vld [vmem:[#allocation2 + $0x50] sm:$0xff]  ;;  %v173_v48 = vsel %vm106_vm0, %v145_v43, 0.0  ;;  %v147_v49 = vmul.f32 %v98_v29, %v82_v28  ;;  %vm456_vm12 = vcmask 851712  }
  0x64   :  { %118 = vst.msk [vmem:[%s974_s5 + $0x58] sm:$0xff] %vm106_vm0, %v85_v30  ;;  %v100_v33 = vld [vmem:[#allocation3 + $0x50] sm:$0xff]  ;;  %134 = vst.msk [vmem:[%s975_s6 + $0x58] sm:$0xff] %vm106_vm0, %v101_v31  ;;  %v87_v34 = vld [vmem:[#allocation2 + $0x68] sm:$0xff]  ;;  %v182_v50 = vsel %vm106_vm0, %v148_v47, 0.0  ;;  %v150_v51 = vmul.f32 %v101_v31, %v85_v30  ;;  %vm463_vm13 = vcmask 917312  }
  0x65   :  { %117 = vst.msk [vmem:[%s974_s5 + $0x50] sm:$0xff] %vm106_vm0, %v84_v32  ;;  %133 = vst.msk [vmem:[%s975_s6 + $0x50] sm:$0xff] %vm106_vm0, %v100_v33  ;;  %v103_v35 = vld [vmem:[#allocation3 + $0x68] sm:$0xff]  ;;  %v86_v36 = vld [vmem:[#allocation2 + $0x60] sm:$0xff]  ;;  %v179_v52 = vsel %vm106_vm0, %v147_v49, 0.0  ;;  %v149_v53 = vmul.f32 %v100_v33, %v84_v32  ;;  %vm470_vm14 = vcmask 982912  }
  0x66   :  { %120 = vst.msk [vmem:[%s974_s5 + $0x68] sm:$0xff] %vm106_vm0, %v87_v34  ;;  %136 = vst.msk [vmem:[%s975_s6 + $0x68] sm:$0xff] %vm106_vm0, %v103_v35  ;;  %v102_v39 = vld [vmem:[#allocation3 + $0x60] sm:$0xff]  ;;  %v89_v40 = vld [vmem:[#allocation2 + $0x78] sm:$0xff]  ;;  %171 = vadd.xlane.f32.xlu1 %v170_v37  ;;  %168 = vadd.xlane.f32.xlu0 %v167_v42  ;;  %v188_v54 = vsel %vm106_vm0, %v150_v51, 0.0  ;;  %v152_v55 = vmul.f32 %v103_v35, %v87_v34  ;;  %vm477_vm15 = vcmask 1048512  }
  0x67   :  { %119 = vst.msk [vmem:[%s974_s5 + $0x60] sm:$0xff] %vm106_vm0, %v86_v36  ;;  %v105_v41 = vld [vmem:[#allocation3 + $0x78] sm:$0xff]  ;;  %135 = vst.msk [vmem:[%s975_s6 + $0x60] sm:$0xff] %vm106_vm0, %v102_v39  ;;  %v88_v44 = vld [vmem:[#allocation2 + $0x70] sm:$0xff]  ;;  %v185_v56 = vsel %vm106_vm0, %v149_v53, 0.0  ;;  %v151_v57 = vmul.f32 %v102_v39, %v86_v36 }
  0x68   :  { %122 = vst.msk [vmem:[%s974_s5 + $0x78] sm:$0xff] %vm106_vm0, %v89_v40  ;;  %138 = vst.msk [vmem:[%s975_s6 + $0x78] sm:$0xff] %vm106_vm0, %v105_v41  ;;  %v104_v45 = vld [vmem:[#allocation3 + $0x70] sm:$0xff]  ;;  %v194_v58 = vsel %vm106_vm0, %v152_v55, 0.0  ;;  %v154_v59 = vmul.f32 %v105_v41, %v89_v40  ;;  %v534_v0 = vld [vmem:[%s971_s2] ss:$0 sm:$0xff] }
  0x69   :  { %121 = vst.msk [vmem:[%s974_s5 + $0x70] sm:$0xff] %vm106_vm0, %v88_v44  ;;  %137 = vst.msk [vmem:[%s975_s6 + $0x70] sm:$0xff] %vm106_vm0, %v104_v45  ;;  %v191_v60 = vsel %vm106_vm0, %v151_v57, 0.0  ;;  %v153_v61 = vmul.f32 %v104_v45, %v88_v44  ;;  %s680_s2 = smov [#allocation8]  }
  0x6a   :  { %177 = vadd.xlane.f32.xlu1 %v176_v46  ;;  %174 = vadd.xlane.f32.xlu0 %v173_v48  ;;  %v200_v62 = vsel %vm106_vm0, %v154_v59, 0.0  ;;  %s491_s10 = sshll.u32 %s680_s2, 4  ;;  %s492_s10 = int_to_ptr.vmem [resolvable:$true] %s491_s10 }
  0x6b   :  { %v197_v63 = vsel %vm106_vm0, %v153_v61, 0.0  ;;  %s629_s11 = scalar_lea.vmem %s492_s10, 16  ;;  %s633_s12 = scalar_lea.vmem %s492_s10, 32 }
  0x6c   :  { %p630_p6 = scmp.ne.s32.totalorder %s492_s10, %s629_s11  ;;  %p634_p7 = scmp.lt.s32.totalorder %s492_s10, %s492_s10 }
  0x6d   :  { %p635_p8 = scmp.lt.s32.totalorder %s633_s12, %s629_s11 }
  0x6e   :  { %183 = vadd.xlane.f32.xlu1 %v182_v50  ;;  %180 = vadd.xlane.f32.xlu0 %v179_v52  ;;  %v368_v50 = vlaneseq }
  0x6f   :  { %p636_p9 = por %p635_p8, %p634_p7 }
  0x70   :  { %v922_v51 = vand.u32 127, %v368_v50  ;;  %v924_v52 = vshrl.u32 %v368_v50, 7 }
  0x71   :  { %p637_p10 = pnand %p636_p9, %p630_p6 }
  0x72   :  { %189 = vadd.xlane.f32.xlu1 %v188_v54  ;;  %186 = vadd.xlane.f32.xlu0 %v185_v56  ;;  %v374_v53 = vadd.s32 4294967288, %v922_v51  ;;  %v381_v54 = vadd.s32 4294967280, %v922_v51  ;;  %v372_v57 = vsub.s32 %v922_v51, %v924_v52  ;;  %v395_v61 = vadd.s32 4294967264, %v922_v51 }
  0x74   :  { %v377_v56 = vsub.s32 %v374_v53, %v924_v52  ;;  %v472_v53 = vadd.s32 4294967176, %v922_v51 }
  0x76   :  { %195 = vadd.xlane.f32.xlu1 %v194_v58  ;;  %192 = vadd.xlane.f32.xlu0 %v191_v60  ;;  %v388_v58 = vadd.s32 4294967272, %v922_v51  ;;  %v384_v60 = vsub.s32 %v381_v54, %v924_v52 }
  0x78   :  { %v391_v1 = vsub.s32 %v388_v58, %v924_v52 }
  0x7a   :  { %201 = vadd.xlane.f32.xlu1 %v200_v62  ;;  %198 = vadd.xlane.f32.xlu0 %v197_v63 }
  0x8b   :  { %214 = vbcast.lane.b32.xlu1 %v534_v0, 264 }
  0x8f   :  { %218 = vbcast.lane.b32.xlu1 %v534_v0, 272 }
  0x90   :  { %210 = vbcast.lane.b32.xlu0 %v534_v0, 256 }
  0x93   :  { %222 = vbcast.lane.b32.xlu1 %v534_v0, 280 }
  0x94   :  { %226 = vbcast.lane.b32.xlu0 %v534_v0, 288 }
  0x97   :  { %230 = vbcast.lane.b32.xlu1 %v534_v0, 296 }
  0x98   :  { %234 = vbcast.lane.b32.xlu0 %v534_v0, 304 }
  0x9b   :  { %238 = vbcast.lane.b32.xlu1 %v534_v0, 312 }
  0x9c   :  { %242 = vbcast.lane.b32.xlu0 %v534_v0, 320 }
  0x9f   :  { %246 = vbcast.lane.b32.xlu1 %v534_v0, 328 }
  0xa0   :  { %250 = vbcast.lane.b32.xlu0 %v534_v0, 336 }
  0xa3   :  { %254 = vbcast.lane.b32.xlu1 %v534_v0, 344 }
  0xa4   :  { %258 = vbcast.lane.b32.xlu0 %v534_v0, 352 }
  0xa7   :  { %262 = vbcast.lane.b32.xlu1 %v534_v0, 360 }
  0xa8   :  { %266 = vbcast.lane.b32.xlu0 %v534_v0, 368 }
  0xab   :  { %270 = vbcast.lane.b32.xlu1 %v534_v0, 376 }
  0xeb   :  { %v163_v2 = vpop.xlane.xlu1 %162  ;;  %v157_v3 = vpop.xlane.xlu0 %156 }
  0xef   :  { %v166_v4 = vpop.xlane.xlu1 %165  ;;  %v160_v5 = vpop.xlane.xlu0 %159 }
  0xf3   :  { %v172_v6 = vpop.xlane.xlu1 %171  ;;  %v169_v7 = vpop.xlane.xlu0 %168 }
  0xf7   :  { %v178_v8 = vpop.xlane.xlu1 %177  ;;  %v175_v9 = vpop.xlane.xlu0 %174 }
  0xfb   :  { %v184_v10 = vpop.xlane.xlu1 %183  ;;  %v181_v11 = vpop.xlane.xlu0 %180 }
  0xff   :  { %v190_v12 = vpop.xlane.xlu1 %189  ;;  %v187_v13 = vpop.xlane.xlu0 %186 }
 0x103   :  { %v196_v14 = vpop.xlane.xlu1 %195  ;;  %v193_v15 = vpop.xlane.xlu0 %192 }
 0x107   :  { %v202_v16 = vpop.xlane.xlu1 %201  ;;  %v199_v17 = vpop.xlane.xlu0 %198 }
 0x10b   :  { %v215_v18 = vpop.permute.xlu1 %214  ;;  %v211_v20 = vpop.permute.xlu0 %210 }
 0x10c   :  { %v289_v19 = vmul.f32 %v215_v18, %v160_v5  ;;  %v288_v21 = vmul.f32 %v211_v20, %v157_v3  ;;  %v409_v5 = vadd.s32 4294967248, %v922_v51 }
 0x10e   :  { %324 = vperm.xlu1 %558, %v289_v19   ;;  %321 = vperm.xlu0 %557, %v288_v21   ;;  %v430_v21 = vadd.s32 4294967224, %v922_v51 }
 0x10f   :  { %v219_v22 = vpop.permute.xlu1 %218  ;;  %v227_v24 = vpop.permute.xlu0 %226 }
 0x110   :  { %v290_v23 = vmul.f32 %v219_v22, %v163_v2  ;;  %v292_v26 = vmul.f32 %v227_v24, %v169_v7  ;;  %v402_v2 = vadd.s32 4294967256, %v922_v51 }
 0x112   :  { %327 = vperm.xlu1 %558, %v290_v23  }
 0x113   :  { %v223_v25 = vpop.permute.xlu1 %222  ;;  %v235_v28 = vpop.permute.xlu0 %234 }
 0x114   :  { %v291_v27 = vmul.f32 %v223_v25, %v166_v4  ;;  %v294_v30 = vmul.f32 %v235_v28, %v175_v9  ;;  %v398_v4 = vsub.s32 %v395_v61, %v924_v52  ;;  %v437_v25 = vadd.s32 4294967216, %v922_v51 }
 0x115   :  { %v475_v61 = vsub.s32 %v472_v53, %v924_v52 }
 0x116   :  { %330 = vperm.xlu0 %557, %v291_v27   ;;  %333 = vperm.xlu1 %558, %v292_v26  }
 0x117   :  { %v231_v29 = vpop.permute.xlu1 %230  ;;  %v243_v32 = vpop.permute.xlu0 %242 }
 0x118   :  { %v293_v31 = vmul.f32 %v231_v29, %v172_v6  ;;  %v296_v34 = vmul.f32 %v243_v32, %v181_v11  ;;  %v416_v11 = vadd.s32 4294967240, %v922_v51 }
 0x11a   :  { %336 = vperm.xlu0 %557, %v293_v31   ;;  %339 = vperm.xlu1 %558, %v294_v30   ;;  %v419_v20 = vsub.s32 %v416_v11, %v924_v52  ;;  %v433_v30 = vsub.s32 %v430_v21, %v924_v52  ;;  %v444_v31 = vadd.s32 4294967208, %v922_v51 }
 0x11b   :  { %v239_v33 = vpop.permute.xlu1 %238  ;;  %v251_v36 = vpop.permute.xlu0 %250 }
 0x11c   :  { %v295_v35 = vmul.f32 %v239_v33, %v178_v8  ;;  %v298_v38 = vmul.f32 %v251_v36, %v187_v13 }
 0x11e   :  { %342 = vperm.xlu0 %557, %v295_v35   ;;  %345 = vperm.xlu1 %558, %v296_v34   ;;  %v440_v34 = vsub.s32 %v437_v25, %v924_v52  ;;  %v451_v35 = vadd.s32 4294967200, %v922_v51 }
 0x11f   :  { %v247_v37 = vpop.permute.xlu1 %246  ;;  %v259_v40 = vpop.permute.xlu0 %258 }
 0x120   :  { %v297_v39 = vmul.f32 %v247_v37, %v184_v10  ;;  %v300_v42 = vmul.f32 %v259_v40, %v193_v15  ;;  %v405_v10 = vsub.s32 %v402_v2, %v924_v52  ;;  %v423_v15 = vadd.s32 4294967232, %v922_v51 }
 0x121   :  { %v447_v40 = vsub.s32 %v444_v31, %v924_v52 }
 0x122   :  { %348 = vperm.xlu0 %557, %v297_v39   ;;  %351 = vperm.xlu1 %558, %v298_v38   ;;  %v426_v24 = vsub.s32 %v423_v15, %v924_v52 }
 0x123   :  { %v255_v41 = vpop.permute.xlu1 %254  ;;  %v267_v44 = vpop.permute.xlu0 %266 }
 0x124   :  { %v299_v43 = vmul.f32 %v255_v41, %v190_v12  ;;  %v302_v46 = vmul.f32 %v267_v44, %v199_v17  ;;  %v458_v41 = vadd.s32 4294967192, %v922_v51  ;;  %v454_v44 = vsub.s32 %v451_v35, %v924_v52 }
 0x126   :  { %354 = vperm.xlu0 %557, %v299_v43   ;;  %357 = vperm.xlu1 %558, %v300_v42   ;;  %v461_v50 = vsub.s32 %v458_v41, %v924_v52 }
 0x127   :  { %v263_v45 = vpop.permute.xlu1 %262 }
 0x128   :  { %v301_v47 = vmul.f32 %v263_v45, %v196_v14  ;;  %v412_v14 = vsub.s32 %v409_v5, %v924_v52  ;;  %v465_v45 = vadd.s32 4294967184, %v922_v51 }
 0x12a   :  { %360 = vperm.xlu0 %557, %v301_v47   ;;  %363 = vperm.xlu1 %558, %v302_v46  }
 0x12b   :  { %v271_v48 = vpop.permute.xlu1 %270 }
 0x12c   :  { %v303_v49 = vmul.f32 %v271_v48, %v202_v16 }
 0x12e   :  { %366 = vperm.xlu0 %557, %v303_v49  }
 0x18d   :  { %v325_v55 = vpop.permute.xlu1 %324  ;;  %v322_v59 = vpop.permute.xlu0 %321 }
 0x18e   :  { %v378_v63 = vrot.slane %v325_v55, %v377_v56  ;;  %v373_v0 = vrot.slane %v322_v59, %v372_v57  ;;  %v468_v56 = vsub.s32 %v465_v45, %v924_v52 }
 0x190   :  { %v380_v8 = vsel %vm379_vm1, %v378_v63, %v373_v0 }
 0x191   :  { %v328_v62 = vpop.permute.xlu1 %327 }
 0x192   :  { %v385_v3 = vrot.slane %v328_v62, %v384_v60 }
 0x194   :  { %v387_v12 = vsel %vm386_vm2, %v385_v3, %v380_v8 }
 0x195   :  { %v334_v6 = vpop.permute.xlu1 %333  ;;  %v331_v7 = vpop.permute.xlu0 %330 }
 0x196   :  { %v392_v9 = vrot.slane %v331_v7, %v391_v1  ;;  %v399_v13 = vrot.slane %v334_v6, %v398_v4 }
 0x198   :  { %v394_v16 = vsel %vm393_vm3, %v392_v9, %v387_v12 }
 0x199   :  { %v340_v17 = vpop.permute.xlu1 %339  ;;  %v337_v18 = vpop.permute.xlu0 %336  ;;  %v401_v23 = vsel %vm400_vm4, %v399_v13, %v394_v16 }
 0x19a   :  { %v406_v19 = vrot.slane %v337_v18, %v405_v10  ;;  %v413_v22 = vrot.slane %v340_v17, %v412_v14 }
 0x19c   :  { %v408_v26 = vsel %vm407_vm5, %v406_v19, %v401_v23 }
 0x19d   :  { %v346_v27 = vpop.permute.xlu1 %345  ;;  %v343_v28 = vpop.permute.xlu0 %342  ;;  %v415_v33 = vsel %vm414_vm6, %v413_v22, %v408_v26 }
 0x19e   :  { %v420_v29 = vrot.slane %v343_v28, %v419_v20  ;;  %v427_v32 = vrot.slane %v346_v27, %v426_v24 }
 0x1a0   :  { %v422_v36 = vsel %vm421_vm7, %v420_v29, %v415_v33 }
 0x1a1   :  { %v352_v37 = vpop.permute.xlu1 %351  ;;  %v349_v38 = vpop.permute.xlu0 %348  ;;  %v429_v43 = vsel %vm428_vm8, %v427_v32, %v422_v36 }
 0x1a2   :  { %v434_v39 = vrot.slane %v349_v38, %v433_v30  ;;  %v441_v42 = vrot.slane %v352_v37, %v440_v34 }
 0x1a4   :  { %v436_v46 = vsel %vm435_vm9, %v434_v39, %v429_v43 }
 0x1a5   :  { %v358_v47 = vpop.permute.xlu1 %357  ;;  %v355_v48 = vpop.permute.xlu0 %354  ;;  %v443_v55 = vsel %vm442_vm10, %v441_v42, %v436_v46 }
 0x1a6   :  { %v448_v49 = vrot.slane %v355_v48, %v447_v40  ;;  %v455_v54 = vrot.slane %v358_v47, %v454_v44 }
 0x1a8   :  { %v450_v57 = vsel %vm449_vm11, %v448_v49, %v443_v55 }
 0x1a9   :  { %v364_v58 = vpop.permute.xlu1 %363  ;;  %v361_v59 = vpop.permute.xlu0 %360  ;;  %v457_v63 = vsel %vm456_vm12, %v455_v54, %v450_v57 }
 0x1aa   :  { %v462_v60 = vrot.slane %v361_v59, %v461_v50  ;;  %v469_v62 = vrot.slane %v364_v58, %v468_v56 }
 0x1ac   :  { %v464_v0 = vsel %vm463_vm13, %v462_v60, %v457_v63 }
 0x1ad   :  { %v367_v1 = vpop.permute.xlu0 %366  ;;  %v471_v2 = vsel %vm470_vm14, %v469_v62, %v464_v0 }
 0x1ae   :  { %v476_v51 = vrot.slane %v367_v1, %v475_v61 }
 0x1b0   :  { %v478_v3 = vsel %vm477_vm15, %v476_v51, %v471_v2 }
 0x1b1   :  { %480 = vst [vmem:[#allocation8] sm:$0x1] %v478_v3 }
 0x1b2   :  { %640 = shalt.err (!%p637_p10)
}
 0x1b3   :  { %s641_s15 = scalar_lea.hbm %s976_s7, 16 }
 0x1b4   :  { %p642_p11 = scmp.ne.s32.totalorder %s976_s7, %s641_s15  ;;  %p645_p12 = scmp.lt.u32.totalorder %s641_s15, %s976_s7 }
 0x1b6   :  { %p647_p13 = pnand %p645_p12, %p642_p11 }
 0x1b8   :  { %650 = shalt.err (!%p647_p13)
}
 0x1b9   :  { %494 = dma.vmem_to_hbm [thread:$0]  %s492_s10, 16, %s976_s7, [#allocation9]  }
 0x1ba   :  { %665 = dma.done.wait [#allocation9], 16  }
 0x1bb   :  { %666 = vsyncadd [#allocation9], 4294967280 }
 0x1bc   :  { %502 = vsyncpa [#allocation9], 1 }
 0x1bd   :  { %503 = vsyncmov [#allocation4] }
 0x1c0   :  { %s504_s18 = vpop.sfrf %503 }
 0x1c1   :  { %p535_p0 = scmp.ne.s32.totalorder %s504_s18, 0 }
 0x1c3   :  { %508 = shalt.err (%p535_p0)  }
 0x1c4   :  { %510 = vsyncmov [#allocation4 + $0x1] }
 0x1c7   :  { %s511_s23 = vpop.sfrf %510 }
 0x1c8   :  { %p536_p1 = scmp.ne.s32.totalorder %s511_s23, 0 }
 0x1ca   :  { %515 = shalt.err (%p536_p1)  }

</bundles_post_ra>
